<compile_context>
chip_gen: v5e
topology: v5e:2x2
jax: 0.10.0
libtpu: 0.0.40
codegen_flags: <defaults>
</compile_context>

<pallas_src>
import functools

import jax
import jax.numpy as jnp
from jax.experimental import pallas as pl
from jax.experimental.pallas import tpu as pltpu


def mlp_kernel(x_ref, w1_ref, b1_ref, w2_ref, b2_ref, w3_ref, b3_ref, o_ref):
    # Fused 3-layer MLP: bf16 operands on the MXU, f32 accumulate, f32 bias add.
    x = x_ref[...]                                                   # bf16 (TB, IN_P)
    h1 = jnp.dot(x, w1_ref[...], preferred_element_type=jnp.float32) + b1_ref[...]
    h1 = jnp.maximum(h1, 0.0)
    h2 = jnp.dot(h1.astype(jnp.bfloat16), w2_ref[...],
                 preferred_element_type=jnp.float32) + b2_ref[...]
    h2 = jnp.maximum(h2, 0.0)
    out = jnp.dot(h2.astype(jnp.bfloat16), w3_ref[...],
                  preferred_element_type=jnp.float32) + b3_ref[...]
    o_ref[...] = out.astype(o_ref.dtype)                            # bf16 writeback


def _round_up(n, m):
    return pl.cdiv(n, m) * m


def _pad_to(a, target_shape):
    pads = [(0, t - s) for s, t in zip(a.shape, target_shape)]
    return jnp.pad(a, pads)


def _tensorcores_per_chip():
    """2 TensorCores per chip on v7x, 1 on v5e/v6e (and as a safe fallback)."""
    try:
        kind = jax.devices()[0].device_kind.lower()
        return 2 if "v7" in kind else 1
    except Exception:  # pragma: no cover - conservative fallback
        return 1


def init_params(key, input_size, hidden_size, n_classes):
    """Deterministic init mimicking nn.Linear's U(-1/sqrt(fan_in), 1/sqrt(fan_in)).

    Weights are stored transposed as (in, out); everything kept in f32 here.
    """
    ks = jax.random.split(key, 6)

    def linear(kw, kb, fan_in, fan_out):
        bound = 1.0 / jnp.sqrt(fan_in)
        w = jax.random.uniform(kw, (fan_in, fan_out), jnp.float32, -bound, bound)
        b = jax.random.uniform(kb, (1, fan_out), jnp.float32, -bound, bound)
        return w, b

    w1, b1 = linear(ks[0], ks[1], input_size, hidden_size)
    w2, b2 = linear(ks[2], ks[3], hidden_size, hidden_size)
    w3, b3 = linear(ks[4], ks[5], hidden_size, n_classes)
    return dict(w1=w1, b1=b1, w2=w2, b2=b2, w3=w3, b3=b3)


def prepare_params(params):
    """One-time pad + cast of the weights/biases to lane-dense padded layout.

    Every feature dim is zero-padded to a multiple of 128 (unmasked vst stores,
    full vreg lanes, full MXU columns).  Weights go to bf16 (MXU-native),
    biases stay f32 (they add into the f32 accumulator).
    """
    w1, b1 = params["w1"], params["b1"]
    w2, b2 = params["w2"], params["b2"]
    w3, b3 = params["w3"], params["b3"]

    in_sz, hid_sz = w1.shape
    n_classes = w3.shape[1]
    IN_P = _round_up(in_sz, 128)
    HID_P = _round_up(hid_sz, 128)
    OUT_P = _round_up(n_classes, 128)

    return dict(
        w1=_pad_to(w1.astype(jnp.bfloat16), (IN_P, HID_P)),
        b1=_pad_to(b1.astype(jnp.float32), (1, HID_P)),
        w2=_pad_to(w2.astype(jnp.bfloat16), (HID_P, HID_P)),
        b2=_pad_to(b2.astype(jnp.float32), (1, HID_P)),
        w3=_pad_to(w3.astype(jnp.bfloat16), (HID_P, OUT_P)),
        b3=_pad_to(b3.astype(jnp.float32), (1, OUT_P)),
    )


def neural_net_forward(x, padded_params, *, n_classes, tile_b=None):
    """Forward pass of the 3-layer MLP on pre-padded params.

    x: (batch, input_size), any float dtype.  Returns (batch, n_classes) f32.
    Intended to be wrapped in jax.jit (n_classes bound statically, e.g. via
    functools.partial) so the cast/pad/slice fuse around the pallas_call.
    """
    w1p, b1p = padded_params["w1"], padded_params["b1"]
    w2p, b2p = padded_params["w2"], padded_params["b2"]
    w3p, b3p = padded_params["w3"], padded_params["b3"]

    B, in_sz = x.shape
    IN_P, HID_P = w1p.shape
    OUT_P = w3p.shape[1]

    # Adaptive batch tile: one grid step per TensorCore (cap 1024 rows/tile).
    if tile_b is None:
        n_cores = _tensorcores_per_chip()
        tile_b = max(128, min(1024, _round_up(pl.cdiv(max(B, 1), n_cores), 128)))
    B_P = _round_up(B, tile_b)

    # Only x needs per-call pad/cast (weights were prepared once).
    xp = _pad_to(x.astype(jnp.bfloat16), (B_P, IN_P))

    # Resident (constant-index) blocks for weights/biases; batch-tiled x/out.
    resident = lambda shape: pl.BlockSpec(shape, lambda i: tuple(0 for _ in shape))

    flops = 2 * B_P * (IN_P * HID_P + HID_P * HID_P + HID_P * OUT_P)
    bytes_accessed = (
        B_P * IN_P * 2                      # x read (bf16)
        + (IN_P * HID_P + HID_P * HID_P + HID_P * OUT_P) * 2   # weights (bf16)
        + (2 * HID_P + OUT_P) * 4           # biases (f32)
        + B_P * OUT_P * 2                   # output write (bf16)
    )

    grid = (B_P // tile_b,)
    out_padded = pl.pallas_call(
        mlp_kernel,
        out_shape=jax.ShapeDtypeStruct((B_P, OUT_P), jnp.bfloat16),
        grid=grid,
        in_specs=[
            pl.BlockSpec((tile_b, IN_P), lambda i: (i, 0)),   # x: batch-tiled
            resident(w1p.shape), resident(b1p.shape),
            resident(w2p.shape), resident(b2p.shape),
            resident(w3p.shape), resident(b3p.shape),
        ],
        out_specs=pl.BlockSpec((tile_b, OUT_P), lambda i: (i, 0)),
        compiler_params=pltpu.CompilerParams(
            dimension_semantics=("parallel",),   # megacore sharding on v7x
        ),
        cost_estimate=pl.CostEstimate(
            flops=flops, transcendentals=0, bytes_accessed=bytes_accessed),
    )(xp, w1p, b1p, w2p, b2p, w3p, b3p)

    # Slice back to the logical output and upcast to f32 (PyTorch parity).
    return out_padded[:B, :n_classes].astype(jnp.float32)


def _reference_forward(x, params):
    """Pure-JAX reference mimicking the kernel's dtype path (bf16 dots/output)."""
    f32 = jnp.float32
    bf16 = jnp.bfloat16
    xb = x.astype(bf16)
    w1 = params["w1"].astype(bf16)
    w2 = params["w2"].astype(bf16)
    w3 = params["w3"].astype(bf16)
    h1 = jnp.dot(xb, w1, preferred_element_type=f32) + params["b1"]
    h1 = jnp.maximum(h1, 0.0)
    h2 = jnp.dot(h1.astype(bf16), w2, preferred_element_type=f32) + params["b2"]
    h2 = jnp.maximum(h2, 0.0)
    out = jnp.dot(h2.astype(bf16), w3, preferred_element_type=f32) + params["b3"]
    return out.astype(bf16).astype(f32)


if __name__ == "__main__":
    key = jax.random.PRNGKey(0)
    k_x, k_p = jax.random.split(key)

    # Small shapes consistent with the module.
    batch, input_size, hidden_size, n_classes = 256, 32, 32, 16
    x = jax.random.normal(k_x, (batch, input_size), jnp.float32)

    raw_params = init_params(k_p, input_size, hidden_size, n_classes)
    padded_params = prepare_params(raw_params)   # one-time pad + cast

    fwd = jax.jit(functools.partial(neural_net_forward, n_classes=n_classes))
    out = fwd(x, padded_params)
    jax.block_until_ready(out)

    ref = _reference_forward(x, raw_params)
    assert out.shape == (batch, n_classes)
    assert jnp.allclose(out, ref, atol=2e-2, rtol=2e-2), (
        f"max abs err {jnp.max(jnp.abs(out - ref))}")

    print("KERNEL_OK")
</pallas_src>

<mosaic_0001>
module attributes {stable_mosaic.version = 11 : i64} {
  func.func @mlp_kernel(%arg0: i32, %arg1: memref<256x128xbf16, #tpu.memory_space<vmem>>, %arg2: memref<128x128xbf16, #tpu.memory_space<vmem>>, %arg3: memref<1x128xf32, #tpu.memory_space<vmem>>, %arg4: memref<128x128xbf16, #tpu.memory_space<vmem>>, %arg5: memref<1x128xf32, #tpu.memory_space<vmem>>, %arg6: memref<128x128xbf16, #tpu.memory_space<vmem>>, %arg7: memref<1x128xf32, #tpu.memory_space<vmem>>, %arg8: memref<256x128xbf16, #tpu.memory_space<vmem>>) attributes {dimension_semantics = [#tpu.dimension_semantics<parallel>], iteration_bounds = array<i64: 1>, scalar_prefetch = 0 : i64, scratch_operands = 0 : i64, tpu.core_type = #tpu.core_type<tc>, window_params = [{transform_indices = @transform_0, window_bounds = array<i64: 256, 128>}, {pipeline_mode = #tpu.pipeline_mode<synchronous>, transform_indices = @transform_1, window_bounds = array<i64: 128, 128>}, {pipeline_mode = #tpu.pipeline_mode<synchronous>, transform_indices = @transform_2, window_bounds = array<i64: 1, 128>}, {pipeline_mode = #tpu.pipeline_mode<synchronous>, transform_indices = @transform_3, window_bounds = array<i64: 128, 128>}, {pipeline_mode = #tpu.pipeline_mode<synchronous>, transform_indices = @transform_4, window_bounds = array<i64: 1, 128>}, {pipeline_mode = #tpu.pipeline_mode<synchronous>, transform_indices = @transform_5, window_bounds = array<i64: 128, 128>}, {pipeline_mode = #tpu.pipeline_mode<synchronous>, transform_indices = @transform_6, window_bounds = array<i64: 1, 128>}, {transform_indices = @transform_7, window_bounds = array<i64: 256, 128>}]} {
    %c0 = arith.constant 0 : index
    %c0_0 = arith.constant 0 : index
    %0 = vector.load %arg1[%c0, %c0_0] : memref<256x128xbf16, #tpu.memory_space<vmem>>, vector<256x128xbf16>
    %c0_1 = arith.constant 0 : index
    %c0_2 = arith.constant 0 : index
    %1 = vector.load %arg2[%c0_1, %c0_2] : memref<128x128xbf16, #tpu.memory_space<vmem>>, vector<128x128xbf16>
    %cst = arith.constant dense<0.000000e+00> : vector<256x128xf32>
    %2 = tpu.matmul %0, %1, %cst {dimension_numbers = #tpu.dot_dimension_numbers<[1], [0], [0], [1], [0, 0, 1, 1], [], []>} : vector<256x128xbf16>, vector<128x128xbf16>, vector<256x128xf32> -> vector<256x128xf32>
    %c0_3 = arith.constant 0 : index
    %c0_4 = arith.constant 0 : index
    %3 = vector.load %arg3[%c0_3, %c0_4] : memref<1x128xf32, #tpu.memory_space<vmem>>, vector<1x128xf32>
    %4 = vector.broadcast %3 : vector<1x128xf32> to vector<256x128xf32>
    %5 = arith.addf %2, %4 : vector<256x128xf32>
    %cst_5 = arith.constant 0.000000e+00 : f32
    %6 = vector.broadcast %cst_5 : f32 to vector<256x128xf32>
    %7 = arith.maximumf %5, %6 : vector<256x128xf32>
    %8 = arith.truncf %7 : vector<256x128xf32> to vector<256x128xbf16>
    %c0_6 = arith.constant 0 : index
    %c0_7 = arith.constant 0 : index
    %9 = vector.load %arg4[%c0_6, %c0_7] : memref<128x128xbf16, #tpu.memory_space<vmem>>, vector<128x128xbf16>
    %cst_8 = arith.constant dense<0.000000e+00> : vector<256x128xf32>
    %10 = tpu.matmul %8, %9, %cst_8 {dimension_numbers = #tpu.dot_dimension_numbers<[1], [0], [0], [1], [0, 0, 1, 1], [], []>} : vector<256x128xbf16>, vector<128x128xbf16>, vector<256x128xf32> -> vector<256x128xf32>
    %c0_9 = arith.constant 0 : index
    %c0_10 = arith.constant 0 : index
    %11 = vector.load %arg5[%c0_9, %c0_10] : memref<1x128xf32, #tpu.memory_space<vmem>>, vector<1x128xf32>
    %12 = vector.broadcast %11 : vector<1x128xf32> to vector<256x128xf32>
    %13 = arith.addf %10, %12 : vector<256x128xf32>
    %cst_11 = arith.constant 0.000000e+00 : f32
    %14 = vector.broadcast %cst_11 : f32 to vector<256x128xf32>
    %15 = arith.maximumf %13, %14 : vector<256x128xf32>
    %16 = arith.truncf %15 : vector<256x128xf32> to vector<256x128xbf16>
    %c0_12 = arith.constant 0 : index
    %c0_13 = arith.constant 0 : index
    %17 = vector.load %arg6[%c0_12, %c0_13] : memref<128x128xbf16, #tpu.memory_space<vmem>>, vector<128x128xbf16>
    %cst_14 = arith.constant dense<0.000000e+00> : vector<256x128xf32>
    %18 = tpu.matmul %16, %17, %cst_14 {dimension_numbers = #tpu.dot_dimension_numbers<[1], [0], [0], [1], [0, 0, 1, 1], [], []>} : vector<256x128xbf16>, vector<128x128xbf16>, vector<256x128xf32> -> vector<256x128xf32>
    %c0_15 = arith.constant 0 : index
    %c0_16 = arith.constant 0 : index
    %19 = vector.load %arg7[%c0_15, %c0_16] : memref<1x128xf32, #tpu.memory_space<vmem>>, vector<1x128xf32>
    %20 = vector.broadcast %19 : vector<1x128xf32> to vector<256x128xf32>
    %21 = arith.addf %18, %20 : vector<256x128xf32>
    %22 = arith.truncf %21 : vector<256x128xf32> to vector<256x128xbf16>
    %c0_17 = arith.constant 0 : index
    %c0_18 = arith.constant 0 : index
    %23 = vector.load %arg8[%c0_17, %c0_18] : memref<256x128xbf16, #tpu.memory_space<vmem>>, vector<256x128xbf16>
    tpu.vector_store %arg8[%c0_17, %c0_18], %22 {strides = array<i32>} : memref<256x128xbf16, #tpu.memory_space<vmem>>, vector<256x128xbf16>,
    return
  }
  func.func @transform_0(%arg0: i32) -> (i32, i32) {
    %c0_i32 = arith.constant 0 : i32
    %c0_i32_0 = arith.constant 0 : i32
    return %arg0, %c0_i32 : i32, i32
  }
  func.func @transform_1(%arg0: i32) -> (i32, i32) {
    %c0_i32 = arith.constant 0 : i32
    %c0_i32_0 = arith.constant 0 : i32
    %c0_i32_1 = arith.constant 0 : i32
    return %c0_i32, %c0_i32_0 : i32, i32
  }
  func.func @transform_2(%arg0: i32) -> (i32, i32) {
    %c0_i32 = arith.constant 0 : i32
    %c0_i32_0 = arith.constant 0 : i32
    %c0_i32_1 = arith.constant 0 : i32
    return %c0_i32, %c0_i32_0 : i32, i32
  }
  func.func @transform_3(%arg0: i32) -> (i32, i32) {
    %c0_i32 = arith.constant 0 : i32
    %c0_i32_0 = arith.constant 0 : i32
    %c0_i32_1 = arith.constant 0 : i32
    return %c0_i32, %c0_i32_0 : i32, i32
  }
  func.func @transform_4(%arg0: i32) -> (i32, i32) {
    %c0_i32 = arith.constant 0 : i32
    %c0_i32_0 = arith.constant 0 : i32
    %c0_i32_1 = arith.constant 0 : i32
    return %c0_i32, %c0_i32_0 : i32, i32
  }
  func.func @transform_5(%arg0: i32) -> (i32, i32) {
    %c0_i32 = arith.constant 0 : i32
    %c0_i32_0 = arith.constant 0 : i32
    %c0_i32_1 = arith.constant 0 : i32
    return %c0_i32, %c0_i32_0 : i32, i32
  }
  func.func @transform_6(%arg0: i32) -> (i32, i32) {
    %c0_i32 = arith.constant 0 : i32
    %c0_i32_0 = arith.constant 0 : i32
    %c0_i32_1 = arith.constant 0 : i32
    return %c0_i32, %c0_i32_0 : i32, i32
  }
  func.func @transform_7(%arg0: i32) -> (i32, i32) {
    %c0_i32 = arith.constant 0 : i32
    %c0_i32_0 = arith.constant 0 : i32
    return %arg0, %c0_i32 : i32, i32
  }
}

</mosaic_0001>

<bundles_post_ra>
// kernel: neural_net_forward.1
= control target key start
LH: loop header
LB: loop body
LE: loop exit
PB: predicated region body
PF: predicated region fallthrough
CT: control target
= control target key end

     0   :  { %s1430_s1 = inlined_call_operand.vmem [shape: bf16[128,128], index: 1, kind: input, shape index: {}]   ;;  %s1431_s2 = inlined_call_operand.vmem [shape: f32[1,128], index: 2, kind: input, shape index: {}]   ;;  %s1432_s0 = inlined_call_operand.vmem [shape: bf16[256,128], index: 0, kind: input, shape index: {}]   ;;  %s1433_s3 = inlined_call_operand.vmem [shape: bf16[128,128], index: 3, kind: input, shape index: {}]   ;;  %s1434_s4 = inlined_call_operand.vmem [shape: f32[1,128], index: 4, kind: input, shape index: {}]   ;;  %s1435_s5 = inlined_call_operand.vmem [shape: bf16[128,128], index: 5, kind: input, shape index: {}]   ;;  %s1436_s6 = inlined_call_operand.vmem [shape: f32[1,128], index: 6, kind: input, shape index: {}]   ;;  %s1437_s7 = inlined_call_operand.vmem [shape: bf16[256,128], index: 7, kind: output, shape index: {}]  }
   0x1   :  { %v972_v0 = vld [vmem:[%s1430_s1 + $0x38] sm:$0xff]  ;;  %v971_v1 = vld [vmem:[%s1430_s1 + $0x30] sm:$0xff]  ;;  %v970_v2 = vld [vmem:[%s1430_s1 + $0x28] sm:$0xff] }
   0x2   :  { %222 = vmatpush.bf16.msra.mxu0 %v972_v0  ;;  %1084 = vmatpush.bf16.msra.mxu3 %v972_v0  ;;  %v969_v3 = vld [vmem:[%s1430_s1 + $0x20] sm:$0xff]  ;;  %v968_v4 = vld [vmem:[%s1430_s1 + $0x18] sm:$0xff]  ;;  %v967_v5 = vld [vmem:[%s1430_s1 + $0x10] sm:$0xff] }
   0x3   :  { %v966_v6 = vld [vmem:[%s1430_s1 + $0x8] sm:$0xff]  ;;  %v965_v7 = vld [vmem:[%s1430_s1] sm:$0xff]  ;;  %v951_v10 = vld [vmem:[%s1432_s0 + $0x10] sm:$0xff] }
   0x4   :  { %v949_v8 = vld [vmem:[%s1432_s0] sm:$0xff]  ;;  %v950_v9 = vld [vmem:[%s1432_s0 + $0x8] sm:$0xff]  ;;  %v952_v11 = vld [vmem:[%s1432_s0 + $0x18] sm:$0xff] }
   0x5   :  { %v961_v12 = vld [vmem:[%s1432_s0 + $0x60] sm:$0xff]  ;;  %v962_v14 = vld [vmem:[%s1432_s0 + $0x68] sm:$0xff]  ;;  %v980_v15 = vld [vmem:[%s1433_s3 + $0x38] sm:$0xff] }
   0x6   :  { %223 = vmatpush.bf16.msra.mxu0 %v971_v1  ;;  %1085 = vmatpush.bf16.msra.mxu3 %v971_v1  ;;  %v953_v13 = vld [vmem:[%s1432_s0 + $0x20] sm:$0xff]  ;;  %v954_v16 = vld [vmem:[%s1432_s0 + $0x28] sm:$0xff]  ;;  %v979_v17 = vld [vmem:[%s1433_s3 + $0x30] sm:$0xff] }
   0x7   :  { %427 = vmatpush.bf16.msra.mxu1 %v980_v15  ;;  %v963_v18 = vld [vmem:[%s1432_s0 + $0x70] sm:$0xff]  ;;  %v978_v19 = vld [vmem:[%s1433_s3 + $0x28] sm:$0xff]  ;;  %v977_v20 = vld [vmem:[%s1433_s3 + $0x20] sm:$0xff] }
   0x8   :  { %v976_v21 = vld [vmem:[%s1433_s3 + $0x18] sm:$0xff]  ;;  %v955_v22 = vld [vmem:[%s1432_s0 + $0x30] sm:$0xff]  ;;  %v974_v24 = vld [vmem:[%s1433_s3 + $0x8] sm:$0xff] }
   0x9   :  { %v975_v23 = vld [vmem:[%s1433_s3 + $0x10] sm:$0xff]  ;;  %v973_v25 = vld [vmem:[%s1433_s3] sm:$0xff]  ;;  %v964_v26 = vld [vmem:[%s1432_s0 + $0x78] sm:$0xff] }
   0xa   :  { %224 = vmatpush.bf16.msra.mxu0 %v970_v2  ;;  %1086 = vmatpush.bf16.msra.mxu3 %v970_v2  ;;  %v956_v27 = vld [vmem:[%s1432_s0 + $0x38] sm:$0xff]  ;;  %v957_v28 = vld [vmem:[%s1432_s0 + $0x40] sm:$0xff]  ;;  %v958_v37 = vld [vmem:[%s1432_s0 + $0x48] sm:$0xff] }
   0xb   :  { %428 = vmatpush.bf16.msra.mxu1 %v979_v17  ;;  %v1241_v30 = vld [vmem:[%s1431_s2] ss:$0 sm:$0xff]  ;;  %v959_v45 = vld [vmem:[%s1432_s0 + $0x50] sm:$0xff]  ;;  %v960_v53 = vld [vmem:[%s1432_s0 + $0x58] sm:$0xff] }
   0xe   :  { %225 = vmatpush.bf16.msra.mxu0 %v969_v3  ;;  %1087 = vmatpush.bf16.msra.mxu3 %v969_v3 }
   0xf   :  { %429 = vmatpush.bf16.msra.mxu1 %v978_v19 }
  0x12   :  { %226 = vmatpush.bf16.msra.mxu0 %v968_v4  ;;  %1088 = vmatpush.bf16.msra.mxu3 %v968_v4 }
  0x13   :  { %430 = vmatpush.bf16.msra.mxu1 %v977_v20 }
  0x16   :  { %227 = vmatpush.bf16.msra.mxu0 %v967_v5  ;;  %1089 = vmatpush.bf16.msra.mxu3 %v967_v5 }
  0x17   :  { %431 = vmatpush.bf16.msra.mxu1 %v976_v21 }
  0x1a   :  { %228 = vmatpush.bf16.msra.mxu0 %v966_v6  ;;  %1090 = vmatpush.bf16.msra.mxu3 %v966_v6 }
  0x1b   :  { %432 = vmatpush.bf16.msra.mxu1 %v975_v23 }
  0x1e   :  { %229 = vmatpush.bf16.msra.mxu0 %v965_v7  ;;  %1091 = vmatpush.bf16.msra.mxu3 %v965_v7 }
  0x1f   :  { %433 = vmatpush.bf16.msra.mxu1 %v974_v24 }
  0x21   :  { %230 = vmatmul.bf16.vlgmr.msra.gmra.mxu0 %v949_v8  ;;  %290 = vmatmul.bf16.vlgmr.msra.gmra.mxu3 %v961_v12 }
  0x22   :  { %1092 = vmatpush.bf16.msrb.mxu3 %v980_v15 }
  0x23   :  { %434 = vmatpush.bf16.msra.mxu1 %v973_v25 }
  0x26   :  { %1093 = vmatpush.bf16.msrb.mxu3 %v979_v17 }
  0x2a   :  { %1094 = vmatpush.bf16.msrb.mxu3 %v978_v19 }
  0x2e   :  { %1095 = vmatpush.bf16.msrb.mxu3 %v977_v20 }
  0x31   :  { %235 = vmatmul.bf16.gmra.mxu0 %v950_v9  ;;  %295 = vmatmul.bf16.gmra.mxu3 %v962_v14 }
  0x32   :  { %1096 = vmatpush.bf16.msrb.mxu3 %v976_v21 }
  0x36   :  { %1097 = vmatpush.bf16.msrb.mxu3 %v975_v23 }
  0x3a   :  { %1098 = vmatpush.bf16.msrb.mxu3 %v974_v24 }
  0x3e   :  { %1099 = vmatpush.bf16.msrb.mxu3 %v973_v25  ;;  %v987_v25 = vld [vmem:[%s1435_s5 + $0x30] sm:$0xff] }
  0x41   :  { %240 = vmatmul.bf16.gmra.mxu0 %v951_v10  ;;  %300 = vmatmul.bf16.gmra.mxu3 %v963_v18  ;;  %v988_v18 = vld [vmem:[%s1435_s5 + $0x38] sm:$0xff] }
  0x42   :  { %632 = vmatpush.bf16.msra.mxu2 %v988_v18  ;;  %1100 = vmatpush.bf16.msra.mxu3 %v988_v18 }
  0x46   :  { %633 = vmatpush.bf16.msra.mxu2 %v987_v25  ;;  %1101 = vmatpush.bf16.msra.mxu3 %v987_v25 }
  0x51   :  { %245 = vmatmul.bf16.gmra.mxu0 %v952_v11  ;;  %305 = vmatmul.bf16.gmra.mxu3 %v964_v26 }
  0x61   :  { %250 = vmatmul.bf16.gmra.mxu0 %v953_v13 }
  0x71   :  { %255 = vmatmul.bf16.gmra.mxu0 %v954_v16 }
  0x81   :  { %260 = vmatmul.bf16.gmra.mxu0 %v955_v22 }
  0x91   :  { %265 = vmatmul.bf16.gmra.mxu0 %v956_v27 }
  0x9e   :  { %v231_v29 = vpop.f32.mrf.mxu0 }
  0x9f   :  { %v232_v31 = vadd.f32 %v1241_v30, %v231_v29  ;;  %v986_v29 = vld [vmem:[%s1435_s5 + $0x28] sm:$0xff] }
  0xa0   :  { %634 = vmatpush.bf16.msra.mxu2 %v986_v29  ;;  %1102 = vmatpush.bf16.msra.mxu3 %v986_v29 }
  0xa1   :  { %270 = vmatmul.bf16.gmra.mxu0 %v957_v28  ;;  %v311_v34 = vmax.f32 %v232_v31, 0.0  ;;  %v985_v31 = vld [vmem:[%s1435_s5 + $0x20] sm:$0xff] }
  0xa4   :  { %v291_v62 = vpop.f32.mrf.mxu3  ;;  %635 = vmatpush.bf16.msra.mxu2 %v985_v31  ;;  %1103 = vmatpush.bf16.msra.mxu3 %v985_v31 }
  0xa5   :  { %v292_v0 = vadd.f32 %v1241_v30, %v291_v62 }
  0xa6   :  { %v233_v32 = vpop.f32.mrf.mxu0 }
  0xa7   :  { %v234_v33 = vadd.f32 %v1241_v30, %v233_v32  ;;  %v335_v6 = vmax.f32 %v292_v0, 0.0 }
  0xa9   :  { %v312_v35 = vmax.f32 %v234_v33, 0.0 }
  0xab   :  { %v343_v36 = vpack.c.bf16 %v312_v35, %v311_v34 }
  0xac   :  { %v293_v3 = vpop.f32.mrf.mxu3 }
  0xad   :  { %435 = vmatmul.bf16.vlgmr.msra.gmra.mxu1 %v343_v36  ;;  %v294_v7 = vadd.f32 %v1241_v30, %v293_v3 }
  0xae   :  { %v236_v38 = vpop.f32.mrf.mxu0 }
  0xaf   :  { %v237_v39 = vadd.f32 %v1241_v30, %v236_v38  ;;  %v336_v9 = vmax.f32 %v294_v7, 0.0 }
  0xb1   :  { %275 = vmatmul.bf16.gmra.mxu0 %v958_v37  ;;  %v313_v42 = vmax.f32 %v237_v39, 0.0  ;;  %v355_v10 = vpack.c.bf16 %v336_v9, %v335_v6  ;;  %v984_v37 = vld [vmem:[%s1435_s5 + $0x18] sm:$0xff]  ;;  %v1305_v6 = vld [vmem:[%s1434_s4] ss:$0 sm:$0xff] }
  0xb2   :  { %636 = vmatpush.bf16.msra.mxu2 %v984_v37  ;;  %1104 = vmatpush.bf16.msra.mxu3 %v984_v37 }
  0xb3   :  { %495 = vmatmul.bf16.vlgmr.msrb.gmra.mxu3 %v355_v10 }
  0xb4   :  { %v296_v12 = vpop.f32.mrf.mxu3 }
  0xb5   :  { %v297_v14 = vadd.f32 %v1241_v30, %v296_v12 }
  0xb6   :  { %v238_v40 = vpop.f32.mrf.mxu0 }
  0xb7   :  { %v239_v41 = vadd.f32 %v1241_v30, %v238_v40  ;;  %v337_v21 = vmax.f32 %v297_v14, 0.0 }
  0xb9   :  { %v314_v43 = vmax.f32 %v239_v41, 0.0 }
  0xbb   :  { %v344_v44 = vpack.c.bf16 %v314_v43, %v313_v42 }
  0xbc   :  { %v298_v17 = vpop.f32.mrf.mxu3 }
  0xbd   :  { %440 = vmatmul.bf16.gmra.mxu1 %v344_v44  ;;  %v299_v22 = vadd.f32 %v1241_v30, %v298_v17  ;;  %v983_v44 = vld [vmem:[%s1435_s5 + $0x10] sm:$0xff] }
  0xbe   :  { %v241_v46 = vpop.f32.mrf.mxu0  ;;  %637 = vmatpush.bf16.msra.mxu2 %v983_v44  ;;  %1105 = vmatpush.bf16.msra.mxu3 %v983_v44 }
  0xbf   :  { %v242_v47 = vadd.f32 %v1241_v30, %v241_v46  ;;  %v338_v24 = vmax.f32 %v299_v22, 0.0 }
  0xc1   :  { %280 = vmatmul.bf16.gmra.mxu0 %v959_v45  ;;  %v315_v50 = vmax.f32 %v242_v47, 0.0  ;;  %v356_v26 = vpack.c.bf16 %v338_v24, %v337_v21 }
  0xc3   :  { %500 = vmatmul.bf16.gmra.mxu3 %v356_v26 }
  0xc4   :  { %v301_v28 = vpop.f32.mrf.mxu3 }
  0xc5   :  { %v302_v33 = vadd.f32 %v1241_v30, %v301_v28 }
  0xc6   :  { %v243_v48 = vpop.f32.mrf.mxu0 }
  0xc7   :  { %v244_v49 = vadd.f32 %v1241_v30, %v243_v48  ;;  %v339_v40 = vmax.f32 %v302_v33, 0.0  ;;  %v982_v48 = vld [vmem:[%s1435_s5 + $0x8] sm:$0xff] }
  0xc8   :  { %638 = vmatpush.bf16.msra.mxu2 %v982_v48  ;;  %1106 = vmatpush.bf16.msra.mxu3 %v982_v48 }
  0xc9   :  { %v316_v51 = vmax.f32 %v244_v49, 0.0  ;;  %v981_v49 = vld [vmem:[%s1435_s5] sm:$0xff] }
  0xcb   :  { %v345_v52 = vpack.c.bf16 %v316_v51, %v315_v50 }
  0xcc   :  { %v303_v36 = vpop.f32.mrf.mxu3  ;;  %639 = vmatpush.bf16.msra.mxu2 %v981_v49  ;;  %1107 = vmatpush.bf16.msra.mxu3 %v981_v49 }
  0xcd   :  { %445 = vmatmul.bf16.gmra.mxu1 %v345_v52  ;;  %v304_v41 = vadd.f32 %v1241_v30, %v303_v36 }
  0xce   :  { %v246_v54 = vpop.f32.mrf.mxu0 }
  0xcf   :  { %v247_v55 = vadd.f32 %v1241_v30, %v246_v54  ;;  %v340_v43 = vmax.f32 %v304_v41, 0.0 }
  0xd1   :  { %285 = vmatmul.bf16.gmra.mxu0 %v960_v53  ;;  %v317_v58 = vmax.f32 %v247_v55, 0.0  ;;  %v357_v45 = vpack.c.bf16 %v340_v43, %v339_v40 }
  0xd3   :  { %505 = vmatmul.bf16.gmra.mxu3 %v357_v45 }
  0xd4   :  { %v306_v47 = vpop.f32.mrf.mxu3 }
  0xd5   :  { %v307_v51 = vadd.f32 %v1241_v30, %v306_v47 }
  0xd6   :  { %v248_v56 = vpop.f32.mrf.mxu0 }
  0xd7   :  { %v249_v57 = vadd.f32 %v1241_v30, %v248_v56 }
  0xd9   :  { %v318_v59 = vmax.f32 %v249_v57, 0.0  ;;  %v341_v57 = vmax.f32 %v307_v51, 0.0 }
  0xdb   :  { %v346_v60 = vpack.c.bf16 %v318_v59, %v317_v58 }
  0xdc   :  { %v308_v54 = vpop.f32.mrf.mxu3 }
  0xdd   :  { %450 = vmatmul.bf16.gmra.mxu1 %v346_v60  ;;  %v309_v58 = vadd.f32 %v1241_v30, %v308_v54 }
  0xde   :  { %v251_v61 = vpop.f32.mrf.mxu0 }
  0xdf   :  { %v252_v63 = vadd.f32 %v1241_v30, %v251_v61  ;;  %v342_v60 = vmax.f32 %v309_v58, 0.0 }
  0xe1   :  { %v319_v4 = vmax.f32 %v252_v63, 0.0  ;;  %v358_v61 = vpack.c.bf16 %v342_v60, %v341_v57 }
  0xe3   :  { %510 = vmatmul.bf16.gmra.mxu3 %v358_v61 }
  0xe6   :  { %v253_v1 = vpop.f32.mrf.mxu0 }
  0xe7   :  { %v254_v2 = vadd.f32 %v1241_v30, %v253_v1 }
  0xe9   :  { %v320_v5 = vmax.f32 %v254_v2, 0.0 }
  0xeb   :  { %v347_v8 = vpack.c.bf16 %v320_v5, %v319_v4 }
  0xed   :  { %455 = vmatmul.bf16.gmra.mxu1 %v347_v8 }
  0xee   :  { %v256_v11 = vpop.f32.mrf.mxu0 }
  0xef   :  { %v257_v13 = vadd.f32 %v1241_v30, %v256_v11 }
  0xf1   :  { %v321_v19 = vmax.f32 %v257_v13, 0.0 }
  0xf6   :  { %v258_v15 = vpop.f32.mrf.mxu0 }
  0xf7   :  { %v259_v16 = vadd.f32 %v1241_v30, %v258_v15 }
  0xf9   :  { %v322_v20 = vmax.f32 %v259_v16, 0.0 }
  0xfb   :  { %v348_v23 = vpack.c.bf16 %v322_v20, %v321_v19 }
  0xfd   :  { %460 = vmatmul.bf16.gmra.mxu1 %v348_v23 }
  0xfe   :  { %v261_v27 = vpop.f32.mrf.mxu0 }
  0xff   :  { %v262_v32 = vadd.f32 %v1241_v30, %v261_v27 }
 0x101   :  { %v323_v38 = vmax.f32 %v262_v32, 0.0 }
 0x106   :  { %v263_v34 = vpop.f32.mrf.mxu0 }
 0x107   :  { %v264_v35 = vadd.f32 %v1241_v30, %v263_v34 }
 0x109   :  { %v324_v39 = vmax.f32 %v264_v35, 0.0 }
 0x10b   :  { %v349_v42 = vpack.c.bf16 %v324_v39, %v323_v38 }
 0x10d   :  { %465 = vmatmul.bf16.gmra.mxu1 %v349_v42 }
 0x10e   :  { %v266_v46 = vpop.f32.mrf.mxu0 }
 0x10f   :  { %v267_v50 = vadd.f32 %v1241_v30, %v266_v46 }
 0x111   :  { %v325_v55 = vmax.f32 %v267_v50, 0.0 }
 0x116   :  { %v268_v52 = vpop.f32.mrf.mxu0 }
 0x117   :  { %v269_v53 = vadd.f32 %v1241_v30, %v268_v52 }
 0x119   :  { %v326_v56 = vmax.f32 %v269_v53, 0.0 }
 0x11b   :  { %v350_v59 = vpack.c.bf16 %v326_v56, %v325_v55 }
 0x11d   :  { %470 = vmatmul.bf16.gmra.mxu1 %v350_v59 }
 0x11e   :  { %v271_v62 = vpop.f32.mrf.mxu0 }
 0x11f   :  { %v272_v63 = vadd.f32 %v1241_v30, %v271_v62 }
 0x121   :  { %v327_v2 = vmax.f32 %v272_v63, 0.0 }
 0x126   :  { %v273_v0 = vpop.f32.mrf.mxu0 }
 0x127   :  { %v274_v1 = vadd.f32 %v1241_v30, %v273_v0 }
 0x129   :  { %v328_v3 = vmax.f32 %v274_v1, 0.0 }
 0x12a   :  { %v436_v4 = vpop.f32.mrf.mxu1 }
 0x12b   :  { %v351_v5 = vpack.c.bf16 %v328_v3, %v327_v2  ;;  %v437_v8 = vadd.f32 %v1305_v6, %v436_v4 }
 0x12d   :  { %475 = vmatmul.bf16.gmra.mxu1 %v351_v5  ;;  %v516_v11 = vmax.f32 %v437_v8, 0.0 }
 0x12e   :  { %v276_v7 = vpop.f32.mrf.mxu0 }
 0x12f   :  { %v277_v12 = vadd.f32 %v1241_v30, %v276_v7 }
 0x131   :  { %v329_v17 = vmax.f32 %v277_v12, 0.0 }
 0x132   :  { %v438_v9 = vpop.f32.mrf.mxu1 }
 0x133   :  { %v439_v10 = vadd.f32 %v1305_v6, %v438_v9 }
 0x135   :  { %v517_v13 = vmax.f32 %v439_v10, 0.0 }
 0x136   :  { %v278_v14 = vpop.f32.mrf.mxu0  ;;  %v496_v58 = vpop.f32.mrf.mxu3 }
 0x137   :  { %v279_v15 = vadd.f32 %v1241_v30, %v278_v14  ;;  %v548_v16 = vpack.c.bf16 %v517_v13, %v516_v11  ;;  %v497_v63 = vadd.f32 %v1305_v6, %v496_v58  ;;  %v1343_v58 = vld [vmem:[%s1436_s6] ss:$0 sm:$0xff] }
 0x139   :  { %v330_v18 = vmax.f32 %v279_v15, 0.0  ;;  %640 = vmatmul.bf16.vlgmr.msra.gmra.mxu2 %v548_v16  ;;  %v540_v2 = vmax.f32 %v497_v63, 0.0 }
 0x13a   :  { %v441_v19 = vpop.f32.mrf.mxu1 }
 0x13b   :  { %v352_v20 = vpack.c.bf16 %v330_v18, %v329_v17  ;;  %v442_v22 = vadd.f32 %v1305_v6, %v441_v19 }
 0x13d   :  { %480 = vmatmul.bf16.gmra.mxu1 %v352_v20  ;;  %v518_v25 = vmax.f32 %v442_v22, 0.0 }
 0x13e   :  { %v281_v21 = vpop.f32.mrf.mxu0  ;;  %v498_v1 = vpop.f32.mrf.mxu3 }
 0x13f   :  { %v282_v26 = vadd.f32 %v1241_v30, %v281_v21  ;;  %v499_v3 = vadd.f32 %v1305_v6, %v498_v1 }
 0x141   :  { %v331_v32 = vmax.f32 %v282_v26, 0.0  ;;  %v541_v4 = vmax.f32 %v499_v3, 0.0 }
 0x142   :  { %v443_v23 = vpop.f32.mrf.mxu1 }
 0x143   :  { %v444_v24 = vadd.f32 %v1305_v6, %v443_v23  ;;  %v560_v5 = vpack.c.bf16 %v541_v4, %v540_v2 }
 0x145   :  { %v519_v27 = vmax.f32 %v444_v24, 0.0  ;;  %700 = vmatmul.bf16.vlgmr.msra.gmra.mxu3 %v560_v5 }
 0x146   :  { %v283_v28 = vpop.f32.mrf.mxu0  ;;  %v501_v9 = vpop.f32.mrf.mxu3 }
 0x147   :  { %v284_v29 = vadd.f32 %v1241_v30, %v283_v28  ;;  %v549_v31 = vpack.c.bf16 %v519_v27, %v518_v25  ;;  %v502_v14 = vadd.f32 %v1305_v6, %v501_v9 }
 0x149   :  { %v332_v33 = vmax.f32 %v284_v29, 0.0  ;;  %645 = vmatmul.bf16.gmra.mxu2 %v549_v31  ;;  %v542_v17 = vmax.f32 %v502_v14, 0.0 }
 0x14a   :  { %v446_v34 = vpop.f32.mrf.mxu1 }
 0x14b   :  { %v353_v35 = vpack.c.bf16 %v332_v33, %v331_v32  ;;  %v447_v37 = vadd.f32 %v1305_v6, %v446_v34 }
 0x14d   :  { %485 = vmatmul.bf16.gmra.mxu1 %v353_v35  ;;  %v520_v40 = vmax.f32 %v447_v37, 0.0 }
 0x14e   :  { %v286_v36 = vpop.f32.mrf.mxu0  ;;  %v503_v16 = vpop.f32.mrf.mxu3 }
 0x14f   :  { %v287_v41 = vadd.f32 %v1241_v30, %v286_v36  ;;  %v504_v18 = vadd.f32 %v1305_v6, %v503_v16 }
 0x151   :  { %v333_v46 = vmax.f32 %v287_v41, 0.0  ;;  %v543_v19 = vmax.f32 %v504_v18, 0.0 }
 0x152   :  { %v448_v38 = vpop.f32.mrf.mxu1 }
 0x153   :  { %v449_v39 = vadd.f32 %v1305_v6, %v448_v38  ;;  %v561_v20 = vpack.c.bf16 %v543_v19, %v542_v17 }
 0x155   :  { %v521_v42 = vmax.f32 %v449_v39, 0.0  ;;  %705 = vmatmul.bf16.gmra.mxu3 %v561_v20 }
 0x156   :  { %v288_v43 = vpop.f32.mrf.mxu0  ;;  %v506_v23 = vpop.f32.mrf.mxu3 }
 0x157   :  { %v289_v44 = vadd.f32 %v1241_v30, %v288_v43  ;;  %v550_v45 = vpack.c.bf16 %v521_v42, %v520_v40  ;;  %v507_v28 = vadd.f32 %v1305_v6, %v506_v23 }
 0x159   :  { %v334_v47 = vmax.f32 %v289_v44, 0.0  ;;  %650 = vmatmul.bf16.gmra.mxu2 %v550_v45  ;;  %v544_v32 = vmax.f32 %v507_v28, 0.0 }
 0x15a   :  { %v451_v48 = vpop.f32.mrf.mxu1 }
 0x15b   :  { %v354_v49 = vpack.c.bf16 %v334_v47, %v333_v46  ;;  %v452_v50 = vadd.f32 %v1305_v6, %v451_v48 }
 0x15d   :  { %490 = vmatmul.bf16.gmra.mxu1 %v354_v49  ;;  %v522_v53 = vmax.f32 %v452_v50, 0.0 }
 0x15e   :  { %v508_v31 = vpop.f32.mrf.mxu3 }
 0x15f   :  { %v509_v33 = vadd.f32 %v1305_v6, %v508_v31 }
 0x161   :  { %v545_v34 = vmax.f32 %v509_v33, 0.0 }
 0x162   :  { %v453_v51 = vpop.f32.mrf.mxu1 }
 0x163   :  { %v454_v52 = vadd.f32 %v1305_v6, %v453_v51  ;;  %v562_v35 = vpack.c.bf16 %v545_v34, %v544_v32 }
 0x165   :  { %v523_v54 = vmax.f32 %v454_v52, 0.0  ;;  %710 = vmatmul.bf16.gmra.mxu3 %v562_v35 }
 0x166   :  { %v511_v38 = vpop.f32.mrf.mxu3 }
 0x167   :  { %v551_v55 = vpack.c.bf16 %v523_v54, %v522_v53  ;;  %v512_v43 = vadd.f32 %v1305_v6, %v511_v38 }
 0x169   :  { %655 = vmatmul.bf16.gmra.mxu2 %v551_v55  ;;  %v546_v46 = vmax.f32 %v512_v43, 0.0 }
 0x16a   :  { %v456_v56 = vpop.f32.mrf.mxu1 }
 0x16b   :  { %v457_v57 = vadd.f32 %v1305_v6, %v456_v56 }
 0x16d   :  { %v524_v60 = vmax.f32 %v457_v57, 0.0 }
 0x16e   :  { %v513_v45 = vpop.f32.mrf.mxu3 }
 0x16f   :  { %v514_v47 = vadd.f32 %v1305_v6, %v513_v45 }
 0x171   :  { %v547_v48 = vmax.f32 %v514_v47, 0.0 }
 0x172   :  { %v458_v30 = vpop.f32.mrf.mxu1 }
 0x173   :  { %v459_v59 = vadd.f32 %v1305_v6, %v458_v30  ;;  %v563_v49 = vpack.c.bf16 %v547_v48, %v546_v46 }
 0x175   :  { %v525_v61 = vmax.f32 %v459_v59, 0.0  ;;  %715 = vmatmul.bf16.gmra.mxu3 %v563_v49 }
 0x177   :  { %v552_v62 = vpack.c.bf16 %v525_v61, %v524_v60 }
 0x179   :  { %660 = vmatmul.bf16.gmra.mxu2 %v552_v62 }
 0x17a   :  { %v461_v0 = vpop.f32.mrf.mxu1 }
 0x17b   :  { %v462_v7 = vadd.f32 %v1305_v6, %v461_v0 }
 0x17d   :  { %v526_v11 = vmax.f32 %v462_v7, 0.0 }
 0x182   :  { %v463_v8 = vpop.f32.mrf.mxu1 }
 0x183   :  { %v464_v10 = vadd.f32 %v1305_v6, %v463_v8 }
 0x185   :  { %v527_v12 = vmax.f32 %v464_v10, 0.0 }
 0x187   :  { %v553_v13 = vpack.c.bf16 %v527_v12, %v526_v11 }
 0x189   :  { %665 = vmatmul.bf16.gmra.mxu2 %v553_v13 }
 0x18a   :  { %v466_v15 = vpop.f32.mrf.mxu1 }
 0x18b   :  { %v467_v21 = vadd.f32 %v1305_v6, %v466_v15 }
 0x18d   :  { %v528_v25 = vmax.f32 %v467_v21, 0.0 }
 0x192   :  { %v468_v22 = vpop.f32.mrf.mxu1 }
 0x193   :  { %v469_v24 = vadd.f32 %v1305_v6, %v468_v22 }
 0x195   :  { %v529_v26 = vmax.f32 %v469_v24, 0.0 }
 0x197   :  { %v554_v27 = vpack.c.bf16 %v529_v26, %v528_v25 }
 0x199   :  { %670 = vmatmul.bf16.gmra.mxu2 %v554_v27 }
 0x19a   :  { %v471_v29 = vpop.f32.mrf.mxu1 }
 0x19b   :  { %v472_v36 = vadd.f32 %v1305_v6, %v471_v29 }
 0x19d   :  { %v530_v40 = vmax.f32 %v472_v36, 0.0 }
 0x1a2   :  { %v473_v37 = vpop.f32.mrf.mxu1 }
 0x1a3   :  { %v474_v39 = vadd.f32 %v1305_v6, %v473_v37 }
 0x1a5   :  { %v531_v41 = vmax.f32 %v474_v39, 0.0 }
 0x1a7   :  { %v555_v42 = vpack.c.bf16 %v531_v41, %v530_v40 }
 0x1a9   :  { %675 = vmatmul.bf16.gmra.mxu2 %v555_v42 }
 0x1aa   :  { %v476_v44 = vpop.f32.mrf.mxu1 }
 0x1ab   :  { %v477_v50 = vadd.f32 %v1305_v6, %v476_v44 }
 0x1ad   :  { %v532_v53 = vmax.f32 %v477_v50, 0.0 }
 0x1b2   :  { %v478_v51 = vpop.f32.mrf.mxu1 }
 0x1b3   :  { %v479_v52 = vadd.f32 %v1305_v6, %v478_v51 }
 0x1b5   :  { %v533_v54 = vmax.f32 %v479_v52, 0.0 }
 0x1b7   :  { %v556_v55 = vpack.c.bf16 %v533_v54, %v532_v53 }
 0x1b9   :  { %680 = vmatmul.bf16.gmra.mxu2 %v556_v55 }
 0x1ba   :  { %v481_v56 = vpop.f32.mrf.mxu1 }
 0x1bb   :  { %v482_v30 = vadd.f32 %v1305_v6, %v481_v56 }
 0x1bc   :  { %v641_v57 = vpop.f32.mrf.mxu2 }
 0x1bd   :  { %v534_v62 = vmax.f32 %v482_v30, 0.0  ;;  %v642_v63 = vadd.f32 %v1343_v58, %v641_v57 }
 0x1c2   :  { %v483_v59 = vpop.f32.mrf.mxu1 }
 0x1c3   :  { %v484_v60 = vadd.f32 %v1305_v6, %v483_v59 }
 0x1c4   :  { %v643_v61 = vpop.f32.mrf.mxu2 }
 0x1c5   :  { %v535_v0 = vmax.f32 %v484_v60, 0.0  ;;  %v644_v1 = vadd.f32 %v1343_v58, %v643_v61 }
 0x1c7   :  { %v992_v2 = vpack.c.bf16 %v644_v1, %v642_v63  ;;  %v557_v3 = vpack.c.bf16 %v535_v0, %v534_v62 }
 0x1c8   :  { %v701_v36 = vpop.f32.mrf.mxu3 }
 0x1c9   :  { %993 = vst [vmem:[%s1437_s7] sm:$0xff] %v992_v2   ;;  %685 = vmatmul.bf16.gmra.mxu2 %v557_v3  ;;  %v702_v40 = vadd.f32 %v1343_v58, %v701_v36 }
 0x1ca   :  { %v486_v4 = vpop.f32.mrf.mxu1 }
 0x1cb   :  { %v487_v7 = vadd.f32 %v1305_v6, %v486_v4 }
 0x1cc   :  { %v646_v5 = vpop.f32.mrf.mxu2 }
 0x1cd   :  { %v536_v11 = vmax.f32 %v487_v7, 0.0  ;;  %v647_v12 = vadd.f32 %v1343_v58, %v646_v5 }
 0x1d0   :  { %v703_v42 = vpop.f32.mrf.mxu3 }
 0x1d1   :  { %v704_v43 = vadd.f32 %v1343_v58, %v703_v42 }
 0x1d2   :  { %v488_v8 = vpop.f32.mrf.mxu1 }
 0x1d3   :  { %v489_v9 = vadd.f32 %v1305_v6, %v488_v8  ;;  %v1052_v44 = vpack.c.bf16 %v704_v43, %v702_v40 }
 0x1d4   :  { %v648_v10 = vpop.f32.mrf.mxu2 }
 0x1d5   :  { %v537_v13 = vmax.f32 %v489_v9, 0.0  ;;  %v649_v14 = vadd.f32 %v1343_v58, %v648_v10  ;;  %1080 = vst [vmem:[%s1437_s7 + $0x60] sm:$0xff] %v1052_v44  }
 0x1d7   :  { %v997_v15 = vpack.c.bf16 %v649_v14, %v647_v12  ;;  %v558_v16 = vpack.c.bf16 %v537_v13, %v536_v11 }
 0x1d8   :  { %v706_v46 = vpop.f32.mrf.mxu3 }
 0x1d9   :  { %1069 = vst [vmem:[%s1437_s7 + $0x8] sm:$0xff] %v997_v15   ;;  %690 = vmatmul.bf16.gmra.mxu2 %v558_v16  ;;  %v707_v50 = vadd.f32 %v1343_v58, %v706_v46 }
 0x1da   :  { %v491_v17 = vpop.f32.mrf.mxu1 }
 0x1db   :  { %v492_v19 = vadd.f32 %v1305_v6, %v491_v17 }
 0x1dc   :  { %v651_v18 = vpop.f32.mrf.mxu2 }
 0x1dd   :  { %v538_v23 = vmax.f32 %v492_v19, 0.0  ;;  %v652_v24 = vadd.f32 %v1343_v58, %v651_v18 }
 0x1e0   :  { %v708_v52 = vpop.f32.mrf.mxu3 }
 0x1e1   :  { %v709_v53 = vadd.f32 %v1343_v58, %v708_v52 }
 0x1e2   :  { %v493_v20 = vpop.f32.mrf.mxu1 }
 0x1e3   :  { %v494_v21 = vadd.f32 %v1305_v6, %v493_v20  ;;  %v1057_v54 = vpack.c.bf16 %v709_v53, %v707_v50 }
 0x1e4   :  { %v653_v22 = vpop.f32.mrf.mxu2 }
 0x1e5   :  { %v539_v25 = vmax.f32 %v494_v21, 0.0  ;;  %v654_v26 = vadd.f32 %v1343_v58, %v653_v22  ;;  %1081 = vst [vmem:[%s1437_s7 + $0x68] sm:$0xff] %v1057_v54  }
 0x1e7   :  { %v1002_v27 = vpack.c.bf16 %v654_v26, %v652_v24  ;;  %v559_v28 = vpack.c.bf16 %v539_v25, %v538_v23 }
 0x1e8   :  { %v711_v56 = vpop.f32.mrf.mxu3 }
 0x1e9   :  { %1070 = vst [vmem:[%s1437_s7 + $0x10] sm:$0xff] %v1002_v27   ;;  %695 = vmatmul.bf16.gmra.mxu2 %v559_v28  ;;  %v712_v60 = vadd.f32 %v1343_v58, %v711_v56 }
 0x1ec   :  { %v656_v29 = vpop.f32.mrf.mxu2 }
 0x1ed   :  { %v657_v32 = vadd.f32 %v1343_v58, %v656_v29 }
 0x1f0   :  { %v713_v62 = vpop.f32.mrf.mxu3 }
 0x1f1   :  { %v714_v63 = vadd.f32 %v1343_v58, %v713_v62 }
 0x1f3   :  { %v1062_v0 = vpack.c.bf16 %v714_v63, %v712_v60 }
 0x1f4   :  { %v658_v31 = vpop.f32.mrf.mxu2 }
 0x1f5   :  { %v659_v6 = vadd.f32 %v1343_v58, %v658_v31  ;;  %1082 = vst [vmem:[%s1437_s7 + $0x70] sm:$0xff] %v1062_v0  }
 0x1f7   :  { %v1007_v33 = vpack.c.bf16 %v659_v6, %v657_v32 }
 0x1f8   :  { %v716_v2 = vpop.f32.mrf.mxu3 }
 0x1f9   :  { %1071 = vst [vmem:[%s1437_s7 + $0x18] sm:$0xff] %v1007_v33   ;;  %v717_v7 = vadd.f32 %v1343_v58, %v716_v2 }
 0x1fc   :  { %v661_v34 = vpop.f32.mrf.mxu2 }
 0x1fd   :  { %v662_v37 = vadd.f32 %v1343_v58, %v661_v34 }
 0x200   :  { %v718_v9 = vpop.f32.mrf.mxu3 }
 0x201   :  { %v719_v10 = vadd.f32 %v1343_v58, %v718_v9 }
 0x203   :  { %v1067_v11 = vpack.c.bf16 %v719_v10, %v717_v7 }
 0x204   :  { %v663_v35 = vpop.f32.mrf.mxu2 }
 0x205   :  { %v664_v38 = vadd.f32 %v1343_v58, %v663_v35  ;;  %1083 = vst [vmem:[%s1437_s7 + $0x78] sm:$0xff] %v1067_v11  }
 0x207   :  { %v1012_v39 = vpack.c.bf16 %v664_v38, %v662_v37 }
 0x209   :  { %1072 = vst [vmem:[%s1437_s7 + $0x20] sm:$0xff] %v1012_v39  }
 0x20c   :  { %v666_v41 = vpop.f32.mrf.mxu2 }
 0x20d   :  { %v667_v47 = vadd.f32 %v1343_v58, %v666_v41 }
 0x214   :  { %v668_v45 = vpop.f32.mrf.mxu2 }
 0x215   :  { %v669_v48 = vadd.f32 %v1343_v58, %v668_v45 }
 0x217   :  { %v1017_v49 = vpack.c.bf16 %v669_v48, %v667_v47 }
 0x219   :  { %1073 = vst [vmem:[%s1437_s7 + $0x28] sm:$0xff] %v1017_v49  }
 0x21c   :  { %v671_v51 = vpop.f32.mrf.mxu2 }
 0x21d   :  { %v672_v57 = vadd.f32 %v1343_v58, %v671_v51 }
 0x224   :  { %v673_v55 = vpop.f32.mrf.mxu2 }
 0x225   :  { %v674_v30 = vadd.f32 %v1343_v58, %v673_v55 }
 0x227   :  { %v1022_v59 = vpack.c.bf16 %v674_v30, %v672_v57 }
 0x229   :  { %1074 = vst [vmem:[%s1437_s7 + $0x30] sm:$0xff] %v1022_v59  }
 0x22c   :  { %v676_v61 = vpop.f32.mrf.mxu2 }
 0x22d   :  { %v677_v3 = vadd.f32 %v1343_v58, %v676_v61 }
 0x234   :  { %v678_v1 = vpop.f32.mrf.mxu2 }
 0x235   :  { %v679_v4 = vadd.f32 %v1343_v58, %v678_v1 }
 0x237   :  { %v1027_v5 = vpack.c.bf16 %v679_v4, %v677_v3 }
 0x239   :  { %1075 = vst [vmem:[%s1437_s7 + $0x38] sm:$0xff] %v1027_v5  }
 0x23c   :  { %v681_v8 = vpop.f32.mrf.mxu2 }
 0x23d   :  { %v682_v13 = vadd.f32 %v1343_v58, %v681_v8 }
 0x244   :  { %v683_v12 = vpop.f32.mrf.mxu2 }
 0x245   :  { %v684_v14 = vadd.f32 %v1343_v58, %v683_v12 }
 0x247   :  { %v1032_v15 = vpack.c.bf16 %v684_v14, %v682_v13 }
 0x249   :  { %1076 = vst [vmem:[%s1437_s7 + $0x40] sm:$0xff] %v1032_v15  }
 0x24c   :  { %v686_v16 = vpop.f32.mrf.mxu2 }
 0x24d   :  { %v687_v18 = vadd.f32 %v1343_v58, %v686_v16 }
 0x254   :  { %v688_v17 = vpop.f32.mrf.mxu2 }
 0x255   :  { %v689_v19 = vadd.f32 %v1343_v58, %v688_v17 }
 0x257   :  { %v1037_v20 = vpack.c.bf16 %v689_v19, %v687_v18 }
 0x259   :  { %1077 = vst [vmem:[%s1437_s7 + $0x48] sm:$0xff] %v1037_v20  }
 0x25c   :  { %v691_v21 = vpop.f32.mrf.mxu2 }
 0x25d   :  { %v692_v23 = vadd.f32 %v1343_v58, %v691_v21 }
 0x264   :  { %v693_v22 = vpop.f32.mrf.mxu2 }
 0x265   :  { %v694_v24 = vadd.f32 %v1343_v58, %v693_v22 }
 0x267   :  { %v1042_v25 = vpack.c.bf16 %v694_v24, %v692_v23 }
 0x269   :  { %1078 = vst [vmem:[%s1437_s7 + $0x50] sm:$0xff] %v1042_v25  }
 0x26c   :  { %v696_v26 = vpop.f32.mrf.mxu2 }
 0x26d   :  { %v697_v28 = vadd.f32 %v1343_v58, %v696_v26 }
 0x274   :  { %v698_v27 = vpop.f32.mrf.mxu2 }
 0x275   :  { %v699_v29 = vadd.f32 %v1343_v58, %v698_v27 }
 0x277   :  { %v1047_v31 = vpack.c.bf16 %v699_v29, %v697_v28 }
 0x279   :  { %1079 = vst [vmem:[%s1437_s7 + $0x58] sm:$0xff] %v1047_v31  }

</bundles_post_ra>
